<compile_context>
chip_gen: v5e
topology: v5e:2x2
jax: 0.10.0
libtpu: 0.0.40
codegen_flags: <defaults>
</compile_context>

<pallas_src>
import functools

import jax
import jax.numpy as jnp
from jax.experimental import pallas as pl
from jax.experimental.pallas import tpu as pltpu

_LANE = 128
_SUB = 8


def _round_up(n, m):
    return ((n + m - 1) // m) * m


# ---------------------------------------------------------------------------
# Kernel 1: streaming masked mean-pool over the sequence axis.
# ---------------------------------------------------------------------------
def _masked_mean_pool_kernel(x_ref, h_ref, pooled_ref, cnt_ref, *, pad_idx):
    s = pl.program_id(1)

    @pl.when(s == 0)
    def _init():
        pooled_ref[...] = jnp.zeros_like(pooled_ref)
        cnt_ref[...] = jnp.zeros_like(cnt_ref)

    mask = (x_ref[...] != pad_idx)                          # (tb, ts) bool
    # one relayout of the mask to (tb, ts, 1); reused for both reductions
    mask_f = mask.astype(h_ref.dtype)[:, :, None]
    pooled_ref[...] += jnp.sum((h_ref[...] * mask_f).astype(jnp.float32), axis=1)
    cnt_ref[...] += jnp.sum(mask_f.astype(jnp.float32), axis=1)          # (tb, 1)

    @pl.when(s == pl.num_programs(1) - 1)
    def _finalize():
        # all-pad rows: clamp denom -> pooled stays 0 (reference would NaN on 0/0)
        denom = jnp.maximum(cnt_ref[...], 1.0)
        pooled_ref[...] = pooled_ref[...] * pl.reciprocal(denom, approx=False)


# ---------------------------------------------------------------------------
# Kernel 2: dense -> ReLU -> cls head on the pooled activations (dropout = id).
# ---------------------------------------------------------------------------
def _mlp_head_kernel(pooled_ref, w1_ref, b1_ref, w2_ref, b2_ref, out_ref):
    z = jnp.dot(pooled_ref[...].astype(w1_ref.dtype), w1_ref[...],
                preferred_element_type=jnp.float32)
    z = jnp.maximum(z + b1_ref[...].astype(jnp.float32), 0.0)
    logits = jnp.dot(z.astype(w2_ref.dtype), w2_ref[...],
                     preferred_element_type=jnp.float32)
    out_ref[...] = (logits + b2_ref[...].astype(jnp.float32)).astype(out_ref.dtype)


# ---------------------------------------------------------------------------
# Tiling / wrapper
# ---------------------------------------------------------------------------
def _pool_tiling(B, S, H, itemsize):
    """Pick (tb, Bp, ts, Sp, h_lane) honoring the (8,128) BlockSpec rules."""
    h_lane = _round_up(max(H, 1), _LANE)          # lanes actually allocated per row
    budget = 8 * 1024 * 1024                      # target bytes per h-tile buffer

    # --- batch tile: multiple of 8 (or the whole tiny batch);
    #     keep >= 2 batch blocks whenever B permits (v7x megacore).
    if B <= _SUB:
        tb, Bp = B, B
    else:
        Bp = _round_up(B, _SUB)
        tb = _SUB
        for cand in (128, 96, 64, 48, 32, 24, 16, 8):
            if cand <= Bp and Bp % cand == 0 and Bp // cand >= 2:
                tb = cand
                break
        # don't let a wide tb force the minimum 128-row seq tile above budget
        if tb > _SUB and tb * h_lane * itemsize * _LANE > budget:
            tb = _SUB

    # --- sequence tile: whole sequence if it fits, otherwise a multiple of 128
    #     (the x-block's lane dim must be 128-divisible or the full extent).
    row_bytes = max(tb * h_lane * itemsize, 1)
    ts_fit = budget // row_bytes
    if ts_fit >= S:
        ts, Sp = S, S
    else:
        ts = max(_LANE, (ts_fit // _LANE) * _LANE)
        Sp = _round_up(S, ts)
    return tb, Bp, ts, Sp, h_lane


def prepare_decoder_cls_params(params):
    """One-time: pad the head weights' OUTPUT dims to lane width (128).

    Padded columns of z are ReLU(0 + 0) = 0 and only meet zero rows of w_cls,
    so the extra columns never affect the real logits.
    """
    w_dense = jnp.asarray(params["w_dense"])
    b_dense = jnp.asarray(params["b_dense"]).reshape(1, -1)
    w_cls = jnp.asarray(params["w_cls"])
    b_cls = jnp.asarray(params["b_cls"]).reshape(1, -1)
    H, Hd = w_dense.shape
    L = w_cls.shape[1]
    Hdp = _round_up(max(Hd, 1), _LANE)
    Lp = _round_up(max(L, 1), _LANE)
    w1 = jnp.zeros((H, Hdp), w_dense.dtype).at[:, :Hd].set(w_dense)
    b1 = jnp.zeros((1, Hdp), b_dense.dtype).at[:, :Hd].set(b_dense)
    w2 = jnp.zeros((Hdp, Lp), w_cls.dtype).at[:Hd, :L].set(w_cls)
    b2 = jnp.zeros((1, Lp), b_cls.dtype).at[:, :L].set(b_cls)
    return {"w1": w1, "b1": b1, "w2": w2, "b2": b2, "hidden": H, "num_labels": L}


def decoder_classification_forward(h, y, x, prepared, pad_idx):
    """vanilla=True forward (eval mode). Returns (logits, y)."""
    B, S, H = h.shape
    assert H == prepared["hidden"]
    L = prepared["num_labels"]
    w1, b1, w2, b2 = prepared["w1"], prepared["b1"], prepared["w2"], prepared["b2"]

    x = x.astype(jnp.int32)
    itemsize = jnp.dtype(h.dtype).itemsize
    tb, Bp, ts, Sp, h_lane = _pool_tiling(B, S, H, itemsize)

    if Bp != B or Sp != S:
        # padded positions carry pad_idx tokens / zero states -> masked out.
        # (costs one extra HBM copy of h; avoided whenever tiles divide B and S)
        h = jnp.zeros((Bp, Sp, H), h.dtype).at[:B, :S].set(h)
        x = jnp.full((Bp, Sp), pad_idx, jnp.int32).at[:B, :S].set(x)

    grid = (Bp // tb, Sp // ts)

    # VMEM budget from (8,128)-padded tile footprints (inputs double-buffered).
    ts_sub = _round_up(ts, _SUB)
    tb_sub = _round_up(tb, _SUB)
    need = (2 * tb * ts_sub * h_lane * itemsize          # h tiles
            + 2 * tb_sub * _round_up(ts, _LANE) * 4      # x tiles
            + 2 * tb_sub * h_lane * 4                    # pooled output block
            + tb_sub * _LANE * 4)                        # count scratch
    vmem_limit = int(min(max(need * 3 // 2, 32 * 1024 * 1024), 56 * 1024 * 1024))

    pool_kernel = functools.partial(_masked_mean_pool_kernel, pad_idx=pad_idx)
    pooled = pl.pallas_call(
        pool_kernel,
        out_shape=jax.ShapeDtypeStruct((Bp, H), jnp.float32),
        grid_spec=pltpu.PrefetchScalarGridSpec(
            num_scalar_prefetch=0,
            grid=grid,
            in_specs=[
                pl.BlockSpec((tb, ts), lambda b, s: (b, s)),        # x tokens
                pl.BlockSpec((tb, ts, H), lambda b, s: (b, s, 0)),  # h states
            ],
            out_specs=pl.BlockSpec((tb, H), lambda b, s: (b, 0)),   # resident over S
            scratch_shapes=[pltpu.VMEM((tb, 1), jnp.float32)],      # token count
        ),
        compiler_params=pltpu.CompilerParams(
            dimension_semantics=("parallel", "arbitrary"),
            vmem_limit_bytes=vmem_limit,
        ),
    )(x, h)

    # Tiny head: whole problem in one VMEM block (weights single-buffered, no grid).
    Lp = w2.shape[1]
    logits_padded = pl.pallas_call(
        _mlp_head_kernel,
        out_shape=jax.ShapeDtypeStruct((Bp, Lp), jnp.float32),
    )(pooled, w1, b1, w2, b2)

    return logits_padded[:B, :L], y


def _reference(h, y, x, params, pad_idx):
    mask = (x != pad_idx).astype(jnp.float32)
    pooled = jnp.sum(h * mask[:, :, None], axis=1) / jnp.sum(mask, axis=1, keepdims=True)
    z = jnp.maximum(pooled @ params["w_dense"] + params["b_dense"], 0.0)
    return z @ params["w_cls"] + params["b_cls"], y


if __name__ == "__main__":
    # model_params = {'hidden_size': 32, 'dropout': 0.1, 'vanilla': True}
    B, S, H, L = 2, 8, 32, 4
    pad_idx = 0

    key = jax.random.PRNGKey(0)
    k_h, k_w1, k_b1, k_w2, k_b2 = jax.random.split(key, 5)

    h = jax.random.normal(k_h, (B, S, H), dtype=jnp.float32)
    # token ids with trailing padding (pad_idx == 0), deterministic
    x = jnp.array([[5, 7, 3, 9, 2, 0, 0, 0],
                   [4, 1, 8, 6, 0, 0, 0, 0]], dtype=jnp.int32)
    y = jnp.array([1, 3], dtype=jnp.int32)  # labels, passed through in vanilla mode

    params = {
        "w_dense": jax.random.normal(k_w1, (H, H), dtype=jnp.float32) * 0.05,
        "b_dense": jax.random.normal(k_b1, (1, H), dtype=jnp.float32) * 0.05,
        "w_cls":   jax.random.normal(k_w2, (H, L), dtype=jnp.float32) * 0.05,
        "b_cls":   jax.random.normal(k_b2, (1, L), dtype=jnp.float32) * 0.05,
    }

    prepared = prepare_decoder_cls_params(params)   # one-time weight padding

    logits, y_out = decoder_classification_forward(h, y, x, prepared, pad_idx)
    logits = jax.block_until_ready(logits)

    ref_logits, _ = _reference(h, y, x, params, pad_idx)
    assert logits.shape == (B, L)
    assert jnp.allclose(logits, ref_logits, atol=1e-4, rtol=1e-4)
    assert jnp.array_equal(y_out, y)

    print("KERNEL_OK")
</pallas_src>

<mosaic_0001>
module attributes {stable_mosaic.version = 11 : i64} {
  func.func @_masked_mean_pool_kernel(%arg0: i32, %arg1: i32, %arg2: memref<2x8xi32, #tpu.memory_space<vmem>>, %arg3: memref<2x8x32xf32, #tpu.memory_space<vmem>>, %arg4: memref<2x32xf32, #tpu.memory_space<vmem>>, %arg5: memref<2x1xf32, #tpu.memory_space<vmem>>) attributes {dimension_semantics = [#tpu.dimension_semantics<parallel>, #tpu.dimension_semantics<arbitrary>], iteration_bounds = array<i64: 1, 1>, scalar_prefetch = 0 : i64, scratch_operands = 1 : i64, tpu.core_type = #tpu.core_type<tc>, window_params = [{transform_indices = @transform_0, window_bounds = array<i64: 2, 8>}, {transform_indices = @transform_1, window_bounds = array<i64: 2, 8, 32>}, {transform_indices = @transform_2, window_bounds = array<i64: 2, 32>}]} {
    %c0_i32 = arith.constant 0 : i32
    %0 = arith.cmpi eq, %arg1, %c0_i32 : i32
    %1 = arith.extui %0 : i1 to i32
    %c0_i32_0 = arith.constant 0 : i32
    %2 = arith.cmpi ne, %1, %c0_i32_0 : i32
    scf.if %2 {
      %cst_17 = arith.constant 0.000000e+00 : f32
      %23 = vector.broadcast %cst_17 : f32 to vector<2x32xf32>
      %c0_18 = arith.constant 0 : index
      %c0_19 = arith.constant 0 : index
      %24 = vector.load %arg4[%c0_18, %c0_19] : memref<2x32xf32, #tpu.memory_space<vmem>>, vector<2x32xf32>
      tpu.vector_store %arg4[%c0_18, %c0_19], %23 {strides = array<i32>} : memref<2x32xf32, #tpu.memory_space<vmem>>, vector<2x32xf32>,
      %cst_20 = arith.constant 0.000000e+00 : f32
      %25 = vector.broadcast %cst_20 : f32 to vector<2x1xf32>
      %c0_21 = arith.constant 0 : index
      %c0_22 = arith.constant 0 : index
      %26 = vector.load %arg5[%c0_21, %c0_22] : memref<2x1xf32, #tpu.memory_space<vmem>>, vector<2x1xf32>
      tpu.vector_store %arg5[%c0_21, %c0_22], %25 {strides = array<i32>} : memref<2x1xf32, #tpu.memory_space<vmem>>, vector<2x1xf32>,
    } else {
    }
    %c0 = arith.constant 0 : index
    %c0_1 = arith.constant 0 : index
    %3 = vector.load %arg2[%c0, %c0_1] : memref<2x8xi32, #tpu.memory_space<vmem>>, vector<2x8xi32>
    %c0_i32_2 = arith.constant 0 : i32
    %4 = vector.broadcast %c0_i32_2 : i32 to vector<2x8xi32>
    %5 = arith.cmpi ne, %3, %4 : vector<2x8xi32>
    %6 = arith.extui %5 : vector<2x8xi1> to vector<2x8xi32>
    %7 = arith.sitofp %6 : vector<2x8xi32> to vector<2x8xf32>
    %8 = vector.shape_cast %7 : vector<2x8xf32> to vector<2x8x1xf32>
    %c0_3 = arith.constant 0 : index
    %c0_4 = arith.constant 0 : index
    %9 = vector.load %arg4[%c0_3, %c0_4] : memref<2x32xf32, #tpu.memory_space<vmem>>, vector<2x32xf32>
    %c0_5 = arith.constant 0 : index
    %c0_6 = arith.constant 0 : index
    %c0_7 = arith.constant 0 : index
    %10 = vector.load %arg3[%c0_5, %c0_6, %c0_7] : memref<2x8x32xf32, #tpu.memory_space<vmem>>, vector<2x8x32xf32>
    %11 = vector.broadcast %8 : vector<2x8x1xf32> to vector<2x8x32xf32>
    %12 = arith.mulf %10, %11 : vector<2x8x32xf32>
    %cst = arith.constant dense<0.000000e+00> : vector<2x32xf32>
    %13 = vector.multi_reduction <add>, %12, %cst [1] : vector<2x8x32xf32> to vector<2x32xf32>
    %14 = arith.addf %9, %13 : vector<2x32xf32>
    %c0_8 = arith.constant 0 : index
    %c0_9 = arith.constant 0 : index
    %15 = vector.load %arg4[%c0_8, %c0_9] : memref<2x32xf32, #tpu.memory_space<vmem>>, vector<2x32xf32>
    tpu.vector_store %arg4[%c0_8, %c0_9], %14 {strides = array<i32>} : memref<2x32xf32, #tpu.memory_space<vmem>>, vector<2x32xf32>,
    %c0_10 = arith.constant 0 : index
    %c0_11 = arith.constant 0 : index
    %16 = vector.load %arg5[%c0_10, %c0_11] : memref<2x1xf32, #tpu.memory_space<vmem>>, vector<2x1xf32>
    %cst_12 = arith.constant dense<0.000000e+00> : vector<2x1xf32>
    %17 = vector.multi_reduction <add>, %8, %cst_12 [1] : vector<2x8x1xf32> to vector<2x1xf32>
    %18 = arith.addf %16, %17 : vector<2x1xf32>
    %c0_13 = arith.constant 0 : index
    %c0_14 = arith.constant 0 : index
    %19 = vector.load %arg5[%c0_13, %c0_14] : memref<2x1xf32, #tpu.memory_space<vmem>>, vector<2x1xf32>
    tpu.vector_store %arg5[%c0_13, %c0_14], %18 {strides = array<i32>} : memref<2x1xf32, #tpu.memory_space<vmem>>, vector<2x1xf32>,
    %c0_i32_15 = arith.constant 0 : i32
    %20 = arith.cmpi eq, %arg1, %c0_i32_15 : i32
    %21 = arith.extui %20 : i1 to i32
    %c0_i32_16 = arith.constant 0 : i32
    %22 = arith.cmpi ne, %21, %c0_i32_16 : i32
    scf.if %22 {
      %c0_17 = arith.constant 0 : index
      %c0_18 = arith.constant 0 : index
      %23 = vector.load %arg5[%c0_17, %c0_18] : memref<2x1xf32, #tpu.memory_space<vmem>>, vector<2x1xf32>
      %cst_19 = arith.constant 1.000000e+00 : f32
      %24 = vector.broadcast %cst_19 : f32 to vector<2x1xf32>
      %25 = arith.maximumf %23, %24 : vector<2x1xf32>
      %c0_20 = arith.constant 0 : index
      %c0_21 = arith.constant 0 : index
      %26 = vector.load %arg4[%c0_20, %c0_21] : memref<2x32xf32, #tpu.memory_space<vmem>>, vector<2x32xf32>
      %27 = tpu.reciprocal %25 : vector<2x1xf32> -> vector<2x1xf32>
      %28 = vector.broadcast %27 : vector<2x1xf32> to vector<2x32xf32>
      %29 = arith.mulf %26, %28 : vector<2x32xf32>
      %c0_22 = arith.constant 0 : index
      %c0_23 = arith.constant 0 : index
      %30 = vector.load %arg4[%c0_22, %c0_23] : memref<2x32xf32, #tpu.memory_space<vmem>>, vector<2x32xf32>
      tpu.vector_store %arg4[%c0_22, %c0_23], %29 {strides = array<i32>} : memref<2x32xf32, #tpu.memory_space<vmem>>, vector<2x32xf32>,
    } else {
    }
    return
  }
  func.func @transform_0(%arg0: i32, %arg1: i32) -> (i32, i32) {
    %c0_i32 = arith.constant 0 : i32
    return %arg0, %arg1 : i32, i32
  }
  func.func @transform_1(%arg0: i32, %arg1: i32) -> (i32, i32, i32) {
    %c0_i32 = arith.constant 0 : i32
    %c0_i32_0 = arith.constant 0 : i32
    return %arg0, %arg1, %c0_i32 : i32, i32, i32
  }
  func.func @transform_2(%arg0: i32, %arg1: i32) -> (i32, i32) {
    %c0_i32 = arith.constant 0 : i32
    %c0_i32_0 = arith.constant 0 : i32
    return %arg0, %c0_i32 : i32, i32
  }
}

</mosaic_0001>

<bundles_post_ra>
// kernel: tpu_custom_call.1
= control target key start
LH: loop header
LB: loop body
LE: loop exit
PB: predicated region body
PF: predicated region fallthrough
CT: control target
= control target key end

     0   :  { %7 = vsyncpa [#allocation4], 0  ;;  %s292_s0 = inlined_call_operand.hbm [shape: s32[2,8], index: 0, kind: input, shape index: {}]   ;;  %s293_s1 = inlined_call_operand.hbm [shape: f32[2,8,32], index: 1, kind: input, shape index: {}]   ;;  %s294_s2 = inlined_call_operand.hbm [shape: f32[2,32], index: 2, kind: output, shape index: {}]  }
   0x1   :  { %8 = vsyncpa [#allocation7], 0 }
   0x2   :  { %9 = vsyncpa [#allocation5], 0  ;;  %s15_s11 = sshll.u32 %s292_s0, 4  ;;  %s256_s12 = smov [#allocation3]   ;;  %s16_s11 = int_to_ptr.hbm [resolvable:$true] %s15_s11 }
   0x3   :  { %s17_s13 = sshll.u32 %s256_s12, 4  ;;  %s25_s16 = sshll.u32 %s293_s1, 4  ;;  %s18_s13 = int_to_ptr.vmem [resolvable:$true] %s17_s13  ;;  %s26_s16 = int_to_ptr.hbm [resolvable:$true] %s25_s16 }
   0x4   :  { %20 = dma.hbm_to_vmem [thread:$0]  %s16_s11, 32, %s18_s13, [#allocation4]  }
   0x5   :  { %s257_s17 = smov [#allocation6]   ;;  %s258_s19 = smov 128  }
   0x6   :  { %s27_s18 = sshll.u32 %s257_s17, 4  ;;  %s259_s20 = smov 8   ;;  %s28_s18 = int_to_ptr.vmem [resolvable:$true] %s27_s18 }
   0x7   :  { %33 = dma.hbm_to_vmem [thread:$0]  %s26_s16, 256, %s28_s18, [#allocation7], %s258_s19, %s258_s19, %s259_s20  }
   0x8   :  { %250 = dma.done.wait [#allocation4], 32  }
   0x9   :  { %251 = vsyncadd [#allocation4], 4294967264 }
   0xa   :  { %252 = dma.done.wait [#allocation7], 256  }
   0xb   :  { %253 = vsyncadd [#allocation7], 4294967040  ;;  %v55_v0 = vlaneseq  ;;  %vm46_vm0 = vcmask 254976   ;;  %vm48_vm1 = vcmask 1024   ;;  %v260_v1 = vmov 0.0   ;;  %v69_v9 = vld [vmem:[#allocation6] sm:$0xff] }
   0xc   :  { %47 = vst.msk [vmem:[#allocation8] sm:$0x3] %vm46_vm0, %v260_v1  ;;  %v50_v3 = vld [vmem:[#allocation3] sm:$0x3]  ;;  %v261_v8 = vmov 0   ;;  %v70_v10 = vld [vmem:[#allocation6 + $0x8] sm:$0xff] }
   0xd   :  { %v56_v2 = vshrl.u32 %v55_v0, 7  ;;  %49 = vst.msk [vmem:[#allocation2] sm:$0x3] %vm48_vm1, %v260_v1  ;;  %vm51_vm2 = vcmp.ne.s32.totalorder %v50_v3, 0  ;;  %vm73_vm3 = vcmask 261120   ;;  %vm90_vm4 = vcmask 1041409  }
   0xe   :  { %v161_v4 = vsel %vm51_vm2, 1.0, %v260_v1  ;;  %s262_s0 = smov [#allocation8]   ;;  %s150_s23 = sshll.u32 %s294_s2, 4  ;;  %s151_s23 = int_to_ptr.hbm [resolvable:$true] %s150_s23 }
   0xf   :  { %169 = vset.pattern.permute.xlu0 %v56_v2  ;;  %v54_v5 = vperm.slane %v161_v4, 0  ;;  %v61_v6 = vperm.slane %v161_v4, 1  ;;  %s148_s1 = sshll.u32 %s262_s0, 4  ;;  %s149_s1 = int_to_ptr.vmem [resolvable:$true] %s148_s1 }
  0x11   :  { %v170_v7 = vpack.i.bf16 %v61_v6, %v54_v5 }
  0x13   :  { %v68_v43 = vld [vmem:[#allocation8] sm:$0x3] }
  0x14   :  { %v96_v37 = vld [vmem:[#allocation2] sm:$0x3] }
  0x17   :  { %171 = vperm.xlu0 %169, %v170_v7  }
  0x1f   :  { %175 = vset.pattern.permute.xlu0 %v261_v8 }
  0x89   :  { %v172_v11 = vpop.permute.xlu0 %171 }
  0x8a   :  { %v174_v12 = vunpack.i.h.bf16 %v172_v11  ;;  %v173_v13 = vunpack.i.l.bf16 %v172_v11 }
  0x8c   :  { %v72_v14 = vmul.f32 %v174_v12, %v70_v10  ;;  %v103_v15 = vrot.slane %v174_v12, 4  ;;  %v71_v16 = vmul.f32 %v173_v13, %v69_v9  ;;  %v97_v17 = vrot.slane %v173_v13, 4 }
  0x8e   :  { %v81_v18 = vsel %vm73_vm3, %v72_v14, 0.0  ;;  %v104_v19 = vadd.f32 %v174_v12, %v103_v15  ;;  %v74_v20 = vsel %vm73_vm3, %v71_v16, 0.0  ;;  %v98_v21 = vadd.f32 %v173_v13, %v97_v17 }
  0x8f   :  { %v82_v22 = vrot.slane %v81_v18, 4  ;;  %v75_v23 = vrot.slane %v74_v20, 4 }
  0x90   :  { %v105_v24 = vrot.slane %v104_v19, 2  ;;  %v99_v25 = vrot.slane %v98_v21, 2 }
  0x91   :  { %v83_v26 = vadd.f32 %v82_v22, %v81_v18  ;;  %v76_v27 = vadd.f32 %v75_v23, %v74_v20 }
  0x92   :  { %v106_v28 = vadd.f32 %v105_v24, %v104_v19  ;;  %v100_v29 = vadd.f32 %v99_v25, %v98_v21 }
  0x93   :  { %v84_v30 = vrot.slane %v83_v26, 2  ;;  %v77_v31 = vrot.slane %v76_v27, 2 }
  0x94   :  { %v107_v32 = vrot.slane %v106_v28, 1  ;;  %v101_v33 = vrot.slane %v100_v29, 1 }
  0x95   :  { %v85_v34 = vadd.f32 %v84_v30, %v83_v26  ;;  %v78_v35 = vadd.f32 %v77_v31, %v76_v27 }
  0x96   :  { %v108_v36 = vadd.f32 %v107_v32, %v106_v28  ;;  %v102_v38 = vadd.f32 %v101_v33, %v100_v29 }
  0x97   :  { %v86_v39 = vrot.slane %v85_v34, 1  ;;  %v79_v40 = vrot.slane %v78_v35, 1 }
  0x98   :  { %v111_v41 = vsel %vm90_vm4, %v108_v36, %v102_v38 }
  0x99   :  { %v87_v42 = vadd.f32 %v86_v39, %v85_v34  ;;  %v80_v44 = vadd.f32 %v79_v40, %v78_v35  ;;  %v113_v45 = vadd.f32 %v111_v41, %v96_v37 }
  0x9b   :  { %v91_v46 = vsel %vm90_vm4, %v87_v42, %v80_v44  ;;  %115 = vst.msk [vmem:[#allocation2] sm:$0x3] %vm48_vm1, %v113_v45 }
  0x9c   :  { %v93_v47 = vadd.f32 %v91_v46, %v68_v43 }
  0x9e   :  { %95 = vst.msk [vmem:[#allocation8] sm:$0x3] %vm46_vm0, %v93_v47 }
  0xa2   :  { %v119_v48 = vld [vmem:[#allocation2] sm:$0x3] }
  0xa3   :  { %v120_v49 = vmax.f32 %v119_v48, 1.0 }
  0xa5   :  { %176 = vrcp.f32 %v120_v49  ;;  %v133_v53 = vand.u32 2147483648, %v120_v49  ;;  %v131_v55 = vand.u32 2147483647, %v120_v49  ;;  %vm127_vm6 = vweird.f32 %v120_v49  ;;  %v121_v61 = vld [vmem:[#allocation8] sm:$0x3] }
  0xa7   :  { %v134_v57 = vor.u32 1.1754944e-38, %v133_v53  ;;  %vm132_vm8 = vcmp.eq.f32.partialorder %v131_v55, 8.507059e+37 }
  0xab   :  { %v177_v50 = vpop.eup %176 }
  0xac   :  { %v123_v51 = vmul.f32 %v177_v50, %v120_v49  ;;  %vm128_vm5 = vweird.f32 %v177_v50 }
  0xad   :  { %vm129_vm7 = vmor %vm127_vm6, %vm128_vm5 }
  0xae   :  { %v124_v52 = vsub.f32 1.0, %v123_v51 }
  0xb0   :  { %v125_v54 = vmul.f32 %v177_v50, %v124_v52 }
  0xb2   :  { %v126_v56 = vadd.f32 %v177_v50, %v125_v54 }
  0xb4   :  { %v130_v58 = vsel %vm129_vm7, %v177_v50, %v126_v56 }
  0xb5   :  { %v135_v59 = vsel %vm132_vm8, %v134_v57, %v130_v58 }
  0xb6   :  { %138 = vperm.xlu0 %175, %v135_v59  }
 0x128   :  { %v139_v60 = vpop.permute.xlu0 %138 }
 0x129   :  { %v141_v62 = vmul.f32 %v139_v60, %v121_v61 }
 0x12b   :  { %142 = vst.msk [vmem:[#allocation8] sm:$0x3] %vm46_vm0, %v141_v62 }
 0x12c   :  { %153 = dma.vmem_to_hbm [thread:$0]  %s149_s1, 32, %s151_s23, [#allocation5]  }
 0x12d   :  { %254 = dma.done.wait [#allocation5], 32  }
 0x12e   :  { %255 = vsyncadd [#allocation5], 4294967264 }
 0x12f   :  { %158 = vsyncpa [#allocation4], 1 }
 0x130   :  { %159 = vsyncpa [#allocation7], 1 }
 0x131   :  { %160 = vsyncpa [#allocation5], 1 }

</bundles_post_ra>
